<compile_context>
chip_gen: v7x
topology: tpu7x:2x2x1
jax: 0.10.0
libtpu: 0.0.40
codegen_flags: <defaults>
</compile_context>

<pallas_src>
import jax
import jax.numpy as jnp
from jax import lax
from jax.experimental import pallas as pl
from jax.experimental.pallas import tpu as pltpu


def _round_up(x, m):
    return ((x + m - 1) // m) * m


def _vmem_capacity_bytes():
    """Physical VMEM per TensorCore; falls back to the smallest (v7x = 64 MiB)."""
    try:
        info = pltpu.get_tpu_info()
        cap = getattr(info, "vmem_capacity_bytes", None)
        if cap:
            return int(cap)
    except Exception:
        pass
    return 64 * 1024 * 1024


def _pick_tile_b(B, S_pad, E, Hd, D_pad, DC, itemsize, vmem_budget):
    """Largest multiple-of-8 batch tile that fits the VMEM budget."""
    if B <= 8:
        return B
    # Weights / bias / v are double-buffered by the default pipeliner
    # (pipeline_mode=pl.Buffered(1) would halve this but is left at the default
    # for compatibility — the budget below already accounts for two buffers).
    fixed = 2 * (Hd + E) * D_pad * itemsize + 2 * 2 * D_pad * 4
    per_row = (2 * S_pad * E * itemsize        # enc tile (double buffered, hot)
               + 2 * Hd * itemsize             # hidden tile (double buffered)
               + 2 * S_pad * 4                 # output tile (double buffered)
               + 4 * S_pad * DC * 4            # live f32 chunk intermediates (+slack)
               + S_pad * 4)                    # score accumulator
    tb = max(8, ((vmem_budget - fixed) // per_row) // 8 * 8)
    # Keep >= 2 grid steps so both v7x TensorCores get work (harmless on
    # single-TC v5e/v6e).
    tb = min(tb, _round_up(pl.cdiv(B, 2), 8))
    return int(min(tb, 256))                   # diminishing returns beyond ~256 rows


def _make_kernel(S, S_pad, DC, n_chunks):
    def kernel(hidden_ref, enc_ref, wh_ref, we_ref, b_ref, v_ref, out_ref):
        # hidden_ref: [Tb, Hd]            enc_ref: [Tb*S_pad, E]
        # wh_ref: [Hd, D_pad]             we_ref:  [E, D_pad]
        # b_ref, v_ref: [1, D_pad] f32    out_ref: [Tb, S_pad] f32 (S on lanes)
        Tb = hidden_ref.shape[0]
        hidden = hidden_ref[...]

        score = jnp.zeros((Tb, S_pad), jnp.float32)
        # Static (fully unrolled) chunk loop over D; chunk count is <= 8 by
        # construction, so this is equivalent to fori_loop(unroll=True) while
        # keeping every weight slice static and lane-aligned.  Only a
        # [Tb, S_pad, DC] f32 slab is live per chunk (never the full D).
        for c in range(n_chunks):
            sl = slice(c * DC, (c + 1) * DC)
            wh_c = wh_ref[:, sl]                               # [Hd, DC]
            we_c = we_ref[:, sl]                               # [E,  DC]
            b_c = b_ref[:, sl]                                 # [1,  DC] f32
            v_c = v_ref[:, sl]                                 # [1,  DC] f32
            h_proj = jnp.dot(hidden, wh_c,
                             preferred_element_type=jnp.float32)          # [Tb, DC]
            e_proj = jnp.dot(enc_ref[...], we_c,
                             preferred_element_type=jnp.float32)          # [Tb*S_pad, DC]
            # Split of aligned leading dims (S_pad multiple of 8 for f32): view.
            a = (e_proj.reshape(Tb, S_pad, DC)
                 + h_proj[:, None, :]
                 + b_c[None, :, :])                                       # f32
            energy = jnp.tanh(a)                                          # EUP
            # self.v(energy).squeeze(2): VPU multiply + lane reduction instead
            # of a width-1 MXU matmul.
            score = score + jnp.sum(energy * v_c[None, :, :], axis=-1)    # [Tb, S_pad]

        # Mask padded src positions (static, S is a trace-time constant).
        if S_pad != S:
            pos = lax.broadcasted_iota(jnp.int32, (Tb, S_pad), 1)
            score = jnp.where(pos < S, score, jnp.float32(-1e30))

        # softmax over src_len (last axis -> lane reductions).
        m = jnp.max(score, axis=-1, keepdims=True)
        ex = jnp.exp(score - m)
        denom = jnp.sum(ex, axis=-1, keepdims=True)
        out_ref[...] = (ex * pl.reciprocal(denom, approx=True)).astype(out_ref.dtype)

    return kernel


def attention_forward(hidden, encoder_outputs, W_attn, b_attn, v_w,
                      *, compute_dtype=jnp.bfloat16, tile_b=None):
    """hidden: [B, Hd]; encoder_outputs: [B, S, E];
    W_attn: [D, Hd+E] (PyTorch Linear weight), b_attn: [D]; v_w: [1, D]."""
    B, Hd = hidden.shape
    _, S, E = encoder_outputs.shape
    D = W_attn.shape[0]
    assert W_attn.shape[1] == Hd + E

    itemsize = jnp.dtype(compute_dtype).itemsize

    # --- static padding so every in-kernel slice / reshape is layout-aligned ---
    # S padded to the bf16 sublane packing (16): [B,S,E] -> [B*S_pad,E] stays a
    # copy-free collapse and padded positions are masked out of the softmax.
    S_pad = _round_up(S, 16)
    # D padded with zero weight/bias/v columns (tanh(0)*0 contributes exactly 0);
    # DC = per-chunk lane width processed inside the kernel.
    if D <= 128:
        D_pad = DC = D
    else:
        D_pad = _round_up(D, 128)
        DC = 128
        while D_pad % DC != 0 or D_pad // DC > 8:
            DC += 128
    n_chunks = D_pad // DC

    # --- parameters: exact split  attn(cat(h,enc)) == h@Wh^T + enc@We^T + b ---
    W = jnp.asarray(W_attn, jnp.float32)
    wh_f = W[:, :Hd].T                                    # [Hd, D]
    we_f = W[:, Hd:].T                                    # [E,  D]
    b_f = jnp.asarray(b_attn, jnp.float32).reshape(-1)
    v_f = jnp.asarray(v_w, jnp.float32).reshape(-1)
    if D_pad != D:
        pad = D_pad - D
        wh_f = jnp.pad(wh_f, ((0, 0), (0, pad)))
        we_f = jnp.pad(we_f, ((0, 0), (0, pad)))
        b_f = jnp.pad(b_f, (0, pad))
        v_f = jnp.pad(v_f, (0, pad))
    wh = wh_f.astype(compute_dtype)                       # [Hd, D_pad]  MXU operand
    we = we_f.astype(compute_dtype)                       # [E,  D_pad]  MXU operand
    b = b_f.reshape(1, D_pad)                             # f32 elementwise path
    v = v_f.reshape(1, D_pad)                             # f32 VPU mul + reduce

    hidden_c = jnp.asarray(hidden, compute_dtype)
    enc_c = jnp.asarray(encoder_outputs, compute_dtype)
    if S_pad != S:
        enc_c = jnp.pad(enc_c, ((0, 0), (0, S_pad - S), (0, 0)))
    enc2 = enc_c.reshape(B * S_pad, E)                    # wrapper-side: free in HBM

    # --- generation-aware VMEM sizing & batch-tile selection ---
    vmem_cap = _vmem_capacity_bytes()                     # 64 MiB (v7x) .. 128 MiB (v5e/v6e)
    vmem_limit = max(32 * 1024 * 1024,
                     min((5 * vmem_cap) // 8, 96 * 1024 * 1024))
    budget = vmem_limit - 6 * 1024 * 1024                 # headroom for compiler scratch
    if tile_b is None:
        tb = _pick_tile_b(B, S_pad, E, Hd, D_pad, DC, itemsize, budget)
    else:
        tb = B if B <= 8 else max(8, (min(int(tile_b), B) // 8) * 8)
    grid = (pl.cdiv(B, tb),)
    # NOTE: if B % tb != 0, the last tile's padded rows compute on stale VMEM
    # data; every reduction in this kernel is per-row and the padded output rows
    # are masked by Pallas, so this is safe.  Do not add cross-row reductions.

    flops = (2 * B * S_pad * E * D_pad + 2 * B * Hd * D_pad
             + 3 * B * S_pad * D_pad + 4 * B * S_pad)
    bytes_accessed = (hidden_c.size * itemsize + enc2.size * itemsize
                      + (wh.size + we.size) * itemsize + (b.size + v.size) * 4
                      + B * S_pad * 4)
    cost = pl.CostEstimate(flops=flops,
                           transcendentals=B * S_pad * D_pad + B * S_pad,
                           bytes_accessed=bytes_accessed)

    kernel = _make_kernel(S, S_pad, DC, n_chunks)
    out = pl.pallas_call(
        kernel,
        out_shape=jax.ShapeDtypeStruct((B, S_pad), jnp.float32),
        grid=grid,
        in_specs=[
            pl.BlockSpec((tb, Hd), lambda i: (i, 0)),          # streamed per batch tile
            pl.BlockSpec((tb * S_pad, E), lambda i: (i, 0)),   # streamed per batch tile (hot)
            # Weights / bias / v: constant index maps -> VMEM-resident across
            # the grid (default double buffering; budgeted for above).
            pl.BlockSpec((Hd, D_pad), lambda i: (0, 0)),
            pl.BlockSpec((E, D_pad), lambda i: (0, 0)),
            pl.BlockSpec((1, D_pad), lambda i: (0, 0)),
            pl.BlockSpec((1, D_pad), lambda i: (0, 0)),
        ],
        out_specs=pl.BlockSpec((tb, S_pad), lambda i: (i, 0)),  # S on the lane axis
        compiler_params=pltpu.CompilerParams(
            dimension_semantics=("parallel",),                  # independent batch tiles
            vmem_limit_bytes=int(vmem_limit)),
        cost_estimate=cost,
    )(hidden_c, enc2, wh, we, b, v)

    return out[:, :S] if S_pad != S else out


def attention_reference(hidden, encoder_outputs, W_attn, b_attn, v_w):
    """Pure-JAX mirror of the PyTorch forward, for validation."""
    B, Hd = hidden.shape
    _, S, E = encoder_outputs.shape
    h_rep = jnp.repeat(hidden[:, None, :], S, axis=1)            # [B, S, Hd]
    cat = jnp.concatenate([h_rep, encoder_outputs], axis=2)      # [B, S, Hd+E]
    a = cat @ W_attn.T + b_attn                                  # [B, S, D]
    energy = jnp.tanh(a)
    attention = (energy @ v_w.T)[..., 0]                         # [B, S]
    return jax.nn.softmax(attention, axis=1)


if __name__ == "__main__":
    def run_case(key, B, S, Hd, E, D, label):
        k1, k2, k3, k4, k5 = jax.random.split(key, 5)
        attn_emb = Hd + E
        hidden = jax.random.normal(k1, (B, Hd), jnp.float32)
        enc = jax.random.normal(k2, (B, S, E), jnp.float32)
        lim_a = 1.0 / (attn_emb ** 0.5)
        lim_v = 1.0 / (D ** 0.5)
        W_attn = jax.random.uniform(k3, (D, attn_emb), jnp.float32, -lim_a, lim_a)
        b_attn = jax.random.uniform(k4, (D,), jnp.float32, -lim_a, lim_a)
        v_w = jax.random.uniform(k5, (1, D), jnp.float32, -lim_v, lim_v)

        ref = attention_reference(hidden, enc, W_attn, b_attn, v_w)

        # f32 MXU operands: tight check (approx reciprocal adds ~1e-4 rel. error).
        out_f32 = jax.block_until_ready(
            attention_forward(hidden, enc, W_attn, b_attn, v_w,
                              compute_dtype=jnp.float32))
        assert out_f32.shape == (B, S), label
        assert jnp.allclose(out_f32, ref, atol=2e-3, rtol=2e-3), f"{label}: f32 mismatch"
        assert jnp.allclose(jnp.sum(out_f32, axis=1), jnp.ones((B,)), atol=1e-2), label

        # bf16 MXU operands (v6e/v7x fast path): looser check (bf16 rounding).
        out_bf16 = jax.block_until_ready(
            attention_forward(hidden, enc, W_attn, b_attn, v_w,
                              compute_dtype=jnp.bfloat16))
        assert out_bf16.shape == (B, S), label
        assert jnp.allclose(out_bf16, ref, atol=2e-2, rtol=5e-2), f"{label}: bf16 mismatch"
        assert jnp.allclose(jnp.sum(out_bf16, axis=1), jnp.ones((B,)), atol=1e-2), label

    key = jax.random.PRNGKey(0)
    ka, kb = jax.random.split(key)
    # Small shapes consistent with the module's forward.
    run_case(ka, B=2, S=8, Hd=16, E=16, D=32, label="small")
    # Exercises S/D padding + softmax masking, the multi-chunk D loop, a ragged
    # final batch tile (B % tb != 0) and a >=2-step grid (v7x megacore split).
    run_case(kb, B=12, S=24, Hd=32, E=48, D=160, label="padded/ragged")

    print("KERNEL_OK")
</pallas_src>

<mosaic_0001>
module attributes {stable_mosaic.version = 11 : i64} {
  func.func @kernel(%arg0: i32, %arg1: memref<2x16xf32, #tpu.memory_space<vmem>>, %arg2: memref<32x16xf32, #tpu.memory_space<vmem>>, %arg3: memref<16x32xf32, #tpu.memory_space<vmem>>, %arg4: memref<16x32xf32, #tpu.memory_space<vmem>>, %arg5: memref<1x32xf32, #tpu.memory_space<vmem>>, %arg6: memref<1x32xf32, #tpu.memory_space<vmem>>, %arg7: memref<2x16xf32, #tpu.memory_space<vmem>>) attributes {dimension_semantics = [#tpu.dimension_semantics<parallel>], iteration_bounds = array<i64: 1>, scalar_prefetch = 0 : i64, scratch_operands = 0 : i64, tpu.core_type = #tpu.core_type<tc>, window_params = [{transform_indices = @transform_0, window_bounds = array<i64: 2, 16>}, {transform_indices = @transform_1, window_bounds = array<i64: 32, 16>}, {pipeline_mode = #tpu.pipeline_mode<synchronous>, transform_indices = @transform_2, window_bounds = array<i64: 16, 32>}, {pipeline_mode = #tpu.pipeline_mode<synchronous>, transform_indices = @transform_3, window_bounds = array<i64: 16, 32>}, {pipeline_mode = #tpu.pipeline_mode<synchronous>, transform_indices = @transform_4, window_bounds = array<i64: 1, 32>}, {pipeline_mode = #tpu.pipeline_mode<synchronous>, transform_indices = @transform_5, window_bounds = array<i64: 1, 32>}, {transform_indices = @transform_6, window_bounds = array<i64: 2, 16>}]} {
    %c0 = arith.constant 0 : index
    %c0_0 = arith.constant 0 : index
    %0 = vector.load %arg1[%c0, %c0_0] : memref<2x16xf32, #tpu.memory_space<vmem>>, vector<2x16xf32>
    %cst = arith.constant 0.000000e+00 : f32
    %1 = vector.broadcast %cst : f32 to vector<2x16xf32>
    %c0_1 = arith.constant 0 : index
    %c0_2 = arith.constant 0 : index
    %2 = vector.load %arg3[%c0_1, %c0_2] : memref<16x32xf32, #tpu.memory_space<vmem>>, vector<16x32xf32>
    %c0_3 = arith.constant 0 : index
    %c0_4 = arith.constant 0 : index
    %3 = vector.load %arg4[%c0_3, %c0_4] : memref<16x32xf32, #tpu.memory_space<vmem>>, vector<16x32xf32>
    %c0_5 = arith.constant 0 : index
    %c0_6 = arith.constant 0 : index
    %4 = vector.load %arg5[%c0_5, %c0_6] : memref<1x32xf32, #tpu.memory_space<vmem>>, vector<1x32xf32>
    %c0_7 = arith.constant 0 : index
    %c0_8 = arith.constant 0 : index
    %5 = vector.load %arg6[%c0_7, %c0_8] : memref<1x32xf32, #tpu.memory_space<vmem>>, vector<1x32xf32>
    %cst_9 = arith.constant dense<0.000000e+00> : vector<2x32xf32>
    %6 = tpu.matmul %0, %2, %cst_9 {dimension_numbers = #tpu.dot_dimension_numbers<[1], [0], [0], [1], [0, 0, 1, 1], [], []>} : vector<2x16xf32>, vector<16x32xf32>, vector<2x32xf32> -> vector<2x32xf32>
    %c0_10 = arith.constant 0 : index
    %c0_11 = arith.constant 0 : index
    %7 = vector.load %arg2[%c0_10, %c0_11] : memref<32x16xf32, #tpu.memory_space<vmem>>, vector<32x16xf32>
    %cst_12 = arith.constant dense<0.000000e+00> : vector<32x32xf32>
    %8 = tpu.matmul %7, %3, %cst_12 {dimension_numbers = #tpu.dot_dimension_numbers<[1], [0], [0], [1], [0, 0, 1, 1], [], []>} : vector<32x16xf32>, vector<16x32xf32>, vector<32x32xf32> -> vector<32x32xf32>
    %9 = vector.shape_cast %8 : vector<32x32xf32> to vector<2x16x32xf32>
    %10 = vector.shape_cast %6 : vector<2x32xf32> to vector<2x1x32xf32>
    %11 = vector.broadcast %10 : vector<2x1x32xf32> to vector<2x16x32xf32>
    %12 = arith.addf %9, %11 : vector<2x16x32xf32>
    %13 = vector.shape_cast %4 : vector<1x32xf32> to vector<1x1x32xf32>
    %14 = vector.broadcast %13 : vector<1x1x32xf32> to vector<2x16x32xf32>
    %15 = arith.addf %12, %14 : vector<2x16x32xf32>
    %16 = math.tanh %15 : vector<2x16x32xf32>
    %17 = vector.shape_cast %5 : vector<1x32xf32> to vector<1x1x32xf32>
    %18 = vector.broadcast %17 : vector<1x1x32xf32> to vector<2x16x32xf32>
    %19 = arith.mulf %16, %18 : vector<2x16x32xf32>
    %cst_13 = arith.constant dense<0.000000e+00> : vector<2x16xf32>
    %20 = vector.multi_reduction <add>, %19, %cst_13 [2] : vector<2x16x32xf32> to vector<2x16xf32>
    %21 = arith.addf %1, %20 : vector<2x16xf32>
    %22 = tpu.iota {dimensions = array<i32: 1>} : vector<2x16xi32>
    %c8_i32 = arith.constant 8 : i32
    %23 = vector.broadcast %c8_i32 : i32 to vector<2x16xi32>
    %24 = arith.cmpi slt, %22, %23 : vector<2x16xi32>
    %cst_14 = arith.constant -1.000000e+30 : f32
    %25 = vector.broadcast %cst_14 : f32 to vector<2x16xf32>
    %26 = arith.select %24, %21, %25 : vector<2x16xi1>, vector<2x16xf32>
    %cst_15 = arith.constant dense<0xFF800000> : vector<2xf32>
    %27 = vector.multi_reduction <maximumf>, %26, %cst_15 [1] : vector<2x16xf32> to vector<2xf32>
    %28 = vector.shape_cast %27 : vector<2xf32> to vector<2x1xf32>
    %29 = vector.broadcast %28 : vector<2x1xf32> to vector<2x16xf32>
    %30 = arith.subf %26, %29 : vector<2x16xf32>
    %31 = math.exp %30 : vector<2x16xf32>
    %cst_16 = arith.constant dense<0.000000e+00> : vector<2xf32>
    %32 = vector.multi_reduction <add>, %31, %cst_16 [1] : vector<2x16xf32> to vector<2xf32>
    %33 = vector.shape_cast %32 : vector<2xf32> to vector<2x1xf32>
    %34 = tpu.reciprocal %33 {approx = true} : vector<2x1xf32> -> vector<2x1xf32>
    %35 = vector.broadcast %34 : vector<2x1xf32> to vector<2x16xf32>
    %36 = arith.mulf %31, %35 : vector<2x16xf32>
    %c0_17 = arith.constant 0 : index
    %c0_18 = arith.constant 0 : index
    %37 = vector.load %arg7[%c0_17, %c0_18] : memref<2x16xf32, #tpu.memory_space<vmem>>, vector<2x16xf32>
    tpu.vector_store %arg7[%c0_17, %c0_18], %36 {strides = array<i32>} : memref<2x16xf32, #tpu.memory_space<vmem>>, vector<2x16xf32>,
    return
  }
  func.func @transform_0(%arg0: i32) -> (i32, i32) {
    %c0_i32 = arith.constant 0 : i32
    %c0_i32_0 = arith.constant 0 : i32
    return %arg0, %c0_i32 : i32, i32
  }
  func.func @transform_1(%arg0: i32) -> (i32, i32) {
    %c0_i32 = arith.constant 0 : i32
    %c0_i32_0 = arith.constant 0 : i32
    return %arg0, %c0_i32 : i32, i32
  }
  func.func @transform_2(%arg0: i32) -> (i32, i32) {
    %c0_i32 = arith.constant 0 : i32
    %c0_i32_0 = arith.constant 0 : i32
    %c0_i32_1 = arith.constant 0 : i32
    return %c0_i32, %c0_i32_0 : i32, i32
  }
  func.func @transform_3(%arg0: i32) -> (i32, i32) {
    %c0_i32 = arith.constant 0 : i32
    %c0_i32_0 = arith.constant 0 : i32
    %c0_i32_1 = arith.constant 0 : i32
    return %c0_i32, %c0_i32_0 : i32, i32
  }
  func.func @transform_4(%arg0: i32) -> (i32, i32) {
    %c0_i32 = arith.constant 0 : i32
    %c0_i32_0 = arith.constant 0 : i32
    %c0_i32_1 = arith.constant 0 : i32
    return %c0_i32, %c0_i32_0 : i32, i32
  }
  func.func @transform_5(%arg0: i32) -> (i32, i32) {
    %c0_i32 = arith.constant 0 : i32
    %c0_i32_0 = arith.constant 0 : i32
    %c0_i32_1 = arith.constant 0 : i32
    return %c0_i32, %c0_i32_0 : i32, i32
  }
  func.func @transform_6(%arg0: i32) -> (i32, i32) {
    %c0_i32 = arith.constant 0 : i32
    %c0_i32_0 = arith.constant 0 : i32
    return %arg0, %c0_i32 : i32, i32
  }
}

</mosaic_0001>

<bundles_post_ra>
// kernel: tpu_custom_call.1
= control target key start
LH: loop header
LB: loop body
LE: loop exit
PB: predicated region body
PF: predicated region fallthrough
CT: control target
= control target key end

     0   :  { %v423_v3 = vmov 0.0|0.0   ;;  %vm424_vm0 = vmmov 0   ;;  %v425_v6 = vmov 0.0   ;;  %vm31_vm1 = vcmask 130048   ;;  %s511_s0 = inlined_call_operand.vmem [shape: f32[2,16], index: 0, kind: input, shape index: {}]   ;;  %s512_s1 = inlined_call_operand.vmem [shape: f32[32,16], index: 1, kind: input, shape index: {}]   ;;  %s513_s2 = inlined_call_operand.vmem [shape: f32[16,32], index: 2, kind: input, shape index: {}]   ;;  %s514_s3 = inlined_call_operand.vmem [shape: f32[16,32], index: 3, kind: input, shape index: {}]   ;;  %s515_s4 = inlined_call_operand.vmem [shape: f32[1,32], index: 4, kind: input, shape index: {}]   ;;  %s516_s5 = inlined_call_operand.vmem [shape: f32[1,32], index: 5, kind: input, shape index: {}]   ;;  %s517_s6 = inlined_call_operand.hbm [shape: f32[2,16], index: 6, kind: output, shape index: {}]  }
   0x1   :  { %v25_v0 = vld [vmem:[%s513_s2] sm:$0xff]  ;;  %v26_v1 = vld [vmem:[%s513_s2 + $0x8] sm:$0xff]  ;;  %375 = vmatprep.subr.bf16.mxu0 %v423_v3  ;;  %362 = vmatprep.mubr.msk.f32.mxu0 %vm424_vm0, %v425_v6 }
   0x2   :  { %v27_v2 = vld [vmem:[%s514_s3] sm:$0xff]  ;;  %v376_v4 = vpack.c.bf16 %v26_v1, %v25_v0  ;;  %v28_v5 = vld [vmem:[%s514_s3 + $0x8] sm:$0xff] }
   0x3   :  { %v105_v7 = vld [vmem:[%s512_s1] sm:$0xff]  ;;  %v378_v8 = vpack.c.bf16 %v28_v5, %v27_v2 }
   0x4   :  { %369 = vmatprep.mubr.msk.f32.mxu1 %vm31_vm1, %v105_v7  ;;  %377 = vmatpush3.bf16.msra.mxu0 %v376_v4  ;;  %v24_v9 = vld [vmem:[%s511_s0] sm:$0x3] }
   0x5   :  { %11 = vsyncpa [#allocation3], 0  ;;  %379 = vmatprep.subr.bf16.mxu1 %v378_v8  ;;  %v106_v10 = vld [vmem:[%s512_s1 + $0x8] sm:$0xff]  ;;  %v107_v11 = vld [vmem:[%s512_s1 + $0x10] sm:$0xff]  ;;  %v426_v13 = vmov 1966171168   ;;  %v210_v15 = vlaneseq }
   0x6   :  { %381 = vmatpush3.bf16.msra.mxu1 %v378_v8  ;;  %v108_v12 = vld [vmem:[%s512_s1 + $0x18] sm:$0xff]  ;;  %v208_v14 = vunpack.c.l.s4 %v426_v13  ;;  %v347_v29 = vld [vmem:[%s515_s4] ss:$0 sm:$0xff]  ;;  %vm267_vm2 = vcmask 261120   ;;  %vm300_vm3 = vcmask 130112   ;;  %vm311_vm4 = vcmask 1041409  }
   0x7   :  { %363 = vmatmul.mubr.msk.f32.vlgmr.msra.gmra.mrb[0].mxu0 %vm31_vm1, %v24_v9  ;;  %v211_v17 = vshrl.u32 %v210_v15, 7  ;;  %v348_v41 = vld [vmem:[%s516_s5] ss:$0 sm:$0xff]  ;;  %v285_v54 = vand.u32 127, %v210_v15  ;;  %vm315_vm6 = vcmask 123904   ;;  %s427_s4 = smov [#allocation2]  }
   0x8   :  { %v209_v16 = vunpack.c.0.s8 %v208_v14  ;;  %s334_s5 = sshll.u32 %s427_s4, 4  ;;  %s335_s5 = int_to_ptr.vmem [resolvable:$true] %s334_s5 }
   0x9   :  { %370 = vmatmul.mubr.msk.f32.vlgmr.msra.gmra.mrb[0].mxu1 %vm31_vm1, %v106_v10  ;;  %v231_v22 = vsub.s32 0, %v211_v17  ;;  %v295_v55 = vadd.s32 4294967288, %v285_v54  ;;  %v293_v59 = vsub.s32 %v285_v54, %v211_v17  ;;  %vm286_vm5 = vcmp.lt.s32.totalorder %v285_v54, 8  ;;  %s399_s15 = scalar_lea.vmem %s335_s5, 32  ;;  %p404_p1 = scmp.lt.s32.totalorder %s335_s5, %s335_s5 }
   0xa   :  { %372 = vmatprep.mubr.msk.f32.mxu1 %vm31_vm1, %v107_v11  ;;  %v212_v18 = vsub.s32 %v209_v16, %v211_v17  ;;  %p400_p0 = scmp.ne.s32.totalorder %s335_s5, %s399_s15  ;;  %p405_p2 = scmp.lt.s32.totalorder %s399_s15, %s399_s15 }
   0xb   :  { %v298_v57 = vsub.s32 %v295_v55, %v211_v17 }
   0xc   :  { %p406_p3 = por %p405_p2, %p404_p1 }
   0xd   :  { %373 = vmatmul.mubr.msk.f32.gmra.mrb[2].mxu1 %vm31_vm1, %v108_v12 }
   0xe   :  { %p407_p4 = pnand %p406_p3, %p400_p0 }
  0xda   :  { %v101_v19 = vpop.f32.mrb[0].mxu0 }
  0xdb   :  { %v213_v20 = vrot.slane %v101_v19, %v212_v18  ;;  %v364_v21 = vpop.f32.mrb[1].mxu0 }
  0xdc   :  { %v371_v23 = vpop.f32.mrb[0].mxu1 }
  0xdd   :  { %v214_v24 = vcombine.high %v213_v20, %v213_v20  ;;  %v221_v25 = vrot.slane %v213_v20, %v212_v18  ;;  %v187_v26 = vpop.f32.mrb[1].mxu1 }
  0xdf   :  { %v232_v27 = vrot.slane %v221_v25, %v231_v22  ;;  %v228_v28 = vrot.slane %v214_v24, %v212_v18 }
  0xe0   :  { %v374_v30 = vpop.f32.mrb[2].mxu1 }
  0xe1   :  { %v240_v31 = vadd.f32 %v371_v23, %v232_v27  ;;  %v239_v32 = vadd.f32 %v232_v27, %v187_v26  ;;  %v236_v33 = vrot.slane %v228_v28, %v231_v22  ;;  %v197_v34 = vpop.f32.mrb[3].mxu1 }
  0xe3   :  { %v250_v35 = vadd.f32 %v347_v29, %v240_v31  ;;  %v249_v36 = vadd.f32 %v347_v29, %v239_v32  ;;  %v242_v37 = vadd.f32 %v374_v30, %v236_v33  ;;  %v241_v38 = vadd.f32 %v236_v33, %v197_v34 }
  0xe5   :  { %387 = vtanh.f32 %v250_v35  ;;  %v252_v39 = vadd.f32 %v347_v29, %v242_v37  ;;  %v251_v40 = vadd.f32 %v347_v29, %v241_v38 }
  0xe6   :  { %389 = vtanh.f32 %v249_v36 }
  0xe7   :  { %391 = vtanh.f32 %v252_v39 }
  0xe8   :  { %393 = vtanh.f32 %v251_v40 }
  0xef   :  { %v388_v42 = vpop.eup %387 }
  0xf0   :  { %v390_v43 = vpop.eup %389  ;;  %v264_v49 = vmul.f32 %v388_v42, %v348_v41 }
  0xf1   :  { %v392_v44 = vpop.eup %391  ;;  %v263_v45 = vmul.f32 %v390_v43, %v348_v41 }
  0xf2   :  { %v394_v46 = vpop.eup %393  ;;  %v266_v51 = vmul.f32 %v392_v44, %v348_v41  ;;  %v271_v52 = vsel %vm267_vm2, %v264_v49, 0.0 }
  0xf3   :  { %v268_v47 = vsel %vm267_vm2, %v263_v45, 0.0  ;;  %v265_v48 = vmul.f32 %v394_v46, %v348_v41 }
  0xf4   :  { %269 = vadd.xlane.f32.xlu0 %v268_v47  ;;  %v277_v53 = vsel %vm267_vm2, %v266_v51, 0.0 }
  0xf5   :  { %v274_v50 = vsel %vm267_vm2, %v265_v48, 0.0 }
  0xf6   :  { %275 = vadd.xlane.f32.xlu1 %v274_v50 }
  0xf8   :  { %272 = vadd.xlane.f32.xlu0 %v271_v52 }
  0xfa   :  { %278 = vadd.xlane.f32.xlu1 %v277_v53 }
 0x181   :  { %v270_v56 = vpop.xlane.xlu0 %269 }
 0x182   :  { %v294_v63 = vrot.slane %v270_v56, %v293_v59 }
 0x183   :  { %v276_v58 = vpop.xlane.xlu1 %275 }
 0x184   :  { %v305_v0 = vrot.slane %v276_v58, %v293_v59 }
 0x185   :  { %v273_v60 = vpop.xlane.xlu0 %272 }
 0x186   :  { %v299_v61 = vrot.slane %v273_v60, %v298_v57 }
 0x187   :  { %v279_v62 = vpop.xlane.xlu1 %278 }
 0x188   :  { %v309_v1 = vrot.slane %v279_v62, %v298_v57  ;;  %v301_v2 = vsel %vm300_vm3, %v299_v61, %v294_v63 }
 0x18a   :  { %v310_v3 = vsel %vm300_vm3, %v309_v1, %v305_v0 }
 0x18b   :  { %v312_v4 = vsel %vm311_vm4, %v310_v3, %v301_v2 }
 0x18c   :  { %v314_v5 = vsel %vm286_vm5, %v312_v4, -1e+30 }
 0x18d   :  { %v316_v6 = vsel %vm315_vm6, %v314_v5, -inf }
 0x18e   :  { %317 = vmax.xlane.f32.xlu0 %v316_v6 }
 0x21b   :  { %v318_v7 = vpop.xlane.xlu0 %317 }
 0x21c   :  { %v319_v8 = vsub.f32 %v314_v5, %v318_v7 }
 0x21e   :  { %v320_v9 = vmul.f32 1.442695, %v319_v8 }
 0x220   :  { %395 = vpow2.f32 %v320_v9 }
 0x22a   :  { %v396_v10 = vpop.eup %395 }
 0x22b   :  { %v322_v11 = vsel %vm315_vm6, %v396_v10, 0.0 }
 0x22c   :  { %323 = vadd.xlane.f32.xlu1 %v322_v11 }
 0x2b9   :  { %v324_v12 = vpop.xlane.xlu1 %323 }
 0x2ba   :  { %397 = vrcp.f32 %v324_v12 }
 0x2c4   :  { %v398_v13 = vpop.eup %397 }
 0x2c5   :  { %v326_v14 = vmul.f32 %v398_v13, %v396_v10 }
 0x2c7   :  { %327 = vst.msk [vmem:[#allocation2] sm:$0x3] %vm315_vm6, %v326_v14 }
 0x2c8   :  { %410 = shalt.err (!%p407_p4)
}
 0x2c9   :  { %s411_s18 = scalar_lea.hbm %s517_s6, 32 }
 0x2ca   :  { %p412_p5 = scmp.ne.s32.totalorder %s517_s6, %s411_s18  ;;  %p415_p6 = scmp.lt.u32.totalorder %s411_s18, %s517_s6 }
 0x2cc   :  { %p417_p7 = pnand %p415_p6, %p412_p5 }
 0x2ce   :  { %420 = shalt.err (!%p417_p7)
}
 0x2cf   :  { %337 = dma.vmem_to_hbm [thread:$0]  %s335_s5, 32, %s517_s6, [#allocation3]  }
 0x2d0   :  { %421 = dma.done.wait [#allocation3], 32  }
 0x2d1   :  { %422 = vsyncadd [#allocation3], 4294967264 }
 0x2d2   :  { %341 = vsyncpa [#allocation3], 1 }

</bundles_post_ra>
